<compile_context>
chip_gen: v7x
topology: tpu7x:2x2x1
jax: 0.10.0
libtpu: 0.0.40
codegen_flags: <defaults>
</compile_context>

<pallas_src>
import numpy as np
import jax
import jax.numpy as jnp
from jax.experimental import pallas as pl
from jax.experimental.pallas import tpu as pltpu


# ----------------------------------------------------------------------------
# Noise schedule (mirrors PredefinedNoiseSchedule.__init__ / EDM.__init__ glue)
# ----------------------------------------------------------------------------
def clip_noise_schedule(alphas2, clip_value=0.001):
    alphas2 = np.concatenate([np.ones(1), alphas2], axis=0)
    alphas_step = alphas2[1:] / alphas2[:-1]
    alphas_step = np.clip(alphas_step, a_min=clip_value, a_max=1.0)
    return np.cumprod(alphas_step, axis=0)


def polynomial_schedule(timesteps, s=1e-4, power=3.0):
    steps = timesteps + 1
    x = np.linspace(0, steps, steps)
    alphas2 = (1 - np.power(x / steps, power)) ** 2
    alphas2 = clip_noise_schedule(alphas2, clip_value=0.001)
    precision = 1 - 2 * s
    return precision * alphas2 + s


def make_gamma_table(noise_schedule, timesteps, precision):
    assert "polynomial" in noise_schedule
    power = float(noise_schedule.split("_")[1])
    alphas2 = polynomial_schedule(timesteps, s=precision, power=power)
    sigmas2 = 1 - alphas2
    gamma = -(np.log(alphas2) - np.log(sigmas2))
    return gamma.astype(np.float32)


OUT_PAD = 128  # lane-dense output width (full vreg lane count)


# ----------------------------------------------------------------------------
# Pallas kernel: whole batch in one un-pipelined step, everything 2-D
# ----------------------------------------------------------------------------
def _dynamics_kernel(x_ref, t_ref, mask_ref, edges_ref, sel_ref, selT_ref,
                     cmask_ref, w1x_ref, w1t_ref, b1_ref, w2_ref, b2_ref,
                     out_ref):
    x = x_ref[...]          # [BN, D]
    mask = mask_ref[...]    # [BN, 1]

    # hidden = silu(x @ W1x + t * w1t + b1) * node_mask        -> [BN, H]
    h = jnp.dot(x, w1x_ref[...], preferred_element_type=jnp.float32)
    h = h + t_ref[...] * w1t_ref[...] + b1_ref[...]
    h = h * jax.nn.sigmoid(h)                                   # SiLU
    h = h * mask

    # edge-mask-weighted neighbor aggregation; edges_ref is block-diagonal
    # over graphs, so one matmul == per-graph edges[b] @ hidden[b]
    agg = jnp.dot(edges_ref[...], h, preferred_element_type=jnp.float32)

    # out = (hidden + agg) @ W2_pad + b2_pad  (padded to 128 lanes) -> [BN, 128]
    out = jnp.dot(h + agg, w2_ref[...],
                  preferred_element_type=jnp.float32) + b2_ref[...]
    out = out * mask

    # per-graph center-of-mass removal on coordinate channels.
    # sel:  [B, BN] one-hot row->graph selector;  selT: [BN, B]
    sel = sel_ref[...]
    mask_w = jnp.broadcast_to(mask, out.shape)                   # [BN, 128]
    counts = jnp.dot(sel, mask_w, preferred_element_type=jnp.float32)  # [B,128]
    sums = jnp.dot(sel, out, preferred_element_type=jnp.float32)       # [B,128]
    means = sums / jnp.maximum(counts, 1.0)
    means = means * cmask_ref[...]          # keep only coordinate channels
    means_rows = jnp.dot(selT_ref[...], means,
                         preferred_element_type=jnp.float32)     # [BN, 128]
    out = out - means_rows * mask

    out_ref[...] = out.astype(out_ref.dtype)


def edm_forward(x, t, node_mask, edge_mask, params, *, n_dims):
    """EDM.forward: net_out = dynamics._forward(t, x, node_mask, edge_mask)."""
    B, N, D = x.shape
    H = params["w1x"].shape[1]
    BN = B * N
    f32 = jnp.float32

    # --- wrapper-side layout plumbing (free / negligible XLA ops) ------------
    x2d = x.reshape(BN, D)                                   # B*N on sublanes
    mask2d = node_mask.reshape(BN, 1)
    t_rows = jnp.repeat(t, N, axis=0)                        # [BN, 1]

    edges = edge_mask.reshape(B, N, N)
    eye_b = jnp.eye(B, dtype=f32)
    # block-diagonal [BN, BN]: zero between graphs -> single matmul aggregation
    edges_bd = (eye_b[:, None, :, None] * edges[:, :, None, :]).reshape(BN, BN)

    sel = jnp.repeat(eye_b, N, axis=1)                       # [B, BN]
    selT = sel.T                                             # [BN, B]

    cmask = (jnp.arange(OUT_PAD) < n_dims).astype(f32)[None, :]   # [1, 128]

    # zero-pad W2 / b2 on the output-feature axis to a full 128-lane width so
    # the kernel's final store is unmasked (lane-dense out_spec).
    w2p = jnp.zeros((H, OUT_PAD), f32).at[:, :D].set(params["w2"])
    b2p = jnp.zeros((1, OUT_PAD), f32).at[:, :D].set(params["b2"])

    vmem = pl.BlockSpec(memory_space=pltpu.MemorySpace.VMEM)
    out_flat = pl.pallas_call(
        _dynamics_kernel,
        out_shape=jax.ShapeDtypeStruct((BN, OUT_PAD), f32),
        in_specs=[vmem] * 12,
        out_specs=vmem,
    )(x2d, t_rows, mask2d, edges_bd, sel, selT, cmask,
      params["w1x"], params["w1t"], params["b1"], w2p, b2p)

    return out_flat[:, :D].reshape(B, N, D)


# ----------------------------------------------------------------------------
# Pure-JAX reference for correctness checking
# ----------------------------------------------------------------------------
def edm_forward_ref(x, t, node_mask, edge_mask, params, *, n_dims):
    B, N, D = x.shape
    edges = edge_mask.reshape(B, N, N)
    h = jnp.einsum("bnd,dh->bnh", x, params["w1x"])
    h = h + t[:, :, None] * params["w1t"][None] + params["b1"][None]
    h = h * jax.nn.sigmoid(h)
    h = h * node_mask
    agg = jnp.einsum("bij,bjh->bih", edges, h)
    out = jnp.einsum("bnh,hd->bnd", h + agg, params["w2"]) + params["b2"][None]
    out = out * node_mask
    count = jnp.maximum(node_mask.sum(axis=1, keepdims=True), 1.0)
    means = out.sum(axis=1, keepdims=True) / count
    coord = (jnp.arange(D) < n_dims).astype(x.dtype)
    return out - means * coord * node_mask


# ----------------------------------------------------------------------------
# Setup / example run
# ----------------------------------------------------------------------------
if __name__ == "__main__":
    # EDM configuration (small but consistent with the module)
    n_dims = 3
    num_classes = 4
    include_charges = 1
    in_node_nf = num_classes + include_charges     # 5
    D = n_dims + in_node_nf                        # 8
    B, N, H = 2, 8, 32
    timesteps = 1000
    norm_values = (1.0, 1.0, 1.0)

    # __init__ glue: predefined noise schedule + check_issues_norm_values
    gamma_table = make_gamma_table("polynomial_2", timesteps, precision=1e-4)
    gamma_0 = gamma_table[0]
    sigma_0 = float(np.sqrt(1.0 / (1.0 + np.exp(-gamma_0))))
    max_norm_value = max(norm_values[1], norm_values[2])
    assert sigma_0 * 8 <= 1.0 / max_norm_value, "norm value check failed"

    # deterministic parameters for the (stand-in) dynamics network
    kp = jax.random.PRNGKey(42)
    k1, k2, k3 = jax.random.split(kp, 3)
    params = {
        "w1x": (jax.random.normal(k1, (D, H), jnp.float32) * 0.1),
        "w1t": (jax.random.normal(k2, (1, H), jnp.float32) * 0.1),
        "b1":  jnp.zeros((1, H), jnp.float32),
        "w2":  (jax.random.normal(k3, (H, D), jnp.float32) * 0.1),
        "b2":  jnp.zeros((1, D), jnp.float32),
    }

    # deterministic example inputs
    key = jax.random.PRNGKey(0)
    kx, kt = jax.random.split(key)
    x = jax.random.normal(kx, (B, N, D), jnp.float32)
    t = jax.random.uniform(kt, (B, 1), jnp.float32)

    # node_mask: first 6 nodes valid in batch 0, first 5 in batch 1
    n_valid = np.array([6, 5])
    node_mask = (np.arange(N)[None, :] < n_valid[:, None]).astype(np.float32)
    node_mask = jnp.asarray(node_mask)[:, :, None]                 # [B, N, 1]

    # edge_mask: fully-connected among valid nodes, no self loops, flat [B*N*N, 1]
    adj = node_mask[:, :, 0][:, :, None] * node_mask[:, :, 0][:, None, :]
    adj = adj * (1.0 - jnp.eye(N, dtype=jnp.float32)[None])
    edge_mask = adj.reshape(B * N * N, 1)

    out = edm_forward(x, t, node_mask, edge_mask, params, n_dims=n_dims)
    jax.block_until_ready(out)
    assert out.shape == (B, N, D)

    ref = edm_forward_ref(x, t, node_mask, edge_mask, params, n_dims=n_dims)
    np.testing.assert_allclose(np.asarray(out), np.asarray(ref),
                               rtol=5e-4, atol=5e-4)
    print("KERNEL_OK")
</pallas_src>

<mosaic_0001>
module attributes {stable_mosaic.version = 11 : i64} {
  func.func @_dynamics_kernel(%arg0: memref<16x8xf32, #tpu.memory_space<vmem>>, %arg1: memref<16x1xf32, #tpu.memory_space<vmem>>, %arg2: memref<16x1xf32, #tpu.memory_space<vmem>>, %arg3: memref<16x16xf32, #tpu.memory_space<vmem>>, %arg4: memref<2x16xf32, #tpu.memory_space<vmem>>, %arg5: memref<16x2xf32, #tpu.memory_space<vmem>>, %arg6: memref<1x128xf32, #tpu.memory_space<vmem>>, %arg7: memref<8x32xf32, #tpu.memory_space<vmem>>, %arg8: memref<1x32xf32, #tpu.memory_space<vmem>>, %arg9: memref<1x32xf32, #tpu.memory_space<vmem>>, %arg10: memref<32x128xf32, #tpu.memory_space<vmem>>, %arg11: memref<1x128xf32, #tpu.memory_space<vmem>>, %arg12: memref<16x128xf32, #tpu.memory_space<vmem>>) attributes {dimension_semantics = [], scalar_prefetch = 0 : i64, scratch_operands = 0 : i64, tpu.core_type = #tpu.core_type<tc>} {
    %c0 = arith.constant 0 : index
    %c0_0 = arith.constant 0 : index
    %0 = vector.load %arg0[%c0, %c0_0] : memref<16x8xf32, #tpu.memory_space<vmem>>, vector<16x8xf32>
    %c0_1 = arith.constant 0 : index
    %c0_2 = arith.constant 0 : index
    %1 = vector.load %arg2[%c0_1, %c0_2] : memref<16x1xf32, #tpu.memory_space<vmem>>, vector<16x1xf32>
    %c0_3 = arith.constant 0 : index
    %c0_4 = arith.constant 0 : index
    %2 = vector.load %arg7[%c0_3, %c0_4] : memref<8x32xf32, #tpu.memory_space<vmem>>, vector<8x32xf32>
    %cst = arith.constant dense<0.000000e+00> : vector<16x32xf32>
    %3 = tpu.matmul %0, %2, %cst {dimension_numbers = #tpu.dot_dimension_numbers<[1], [0], [0], [1], [0, 0, 1, 1], [], []>} : vector<16x8xf32>, vector<8x32xf32>, vector<16x32xf32> -> vector<16x32xf32>
    %c0_5 = arith.constant 0 : index
    %c0_6 = arith.constant 0 : index
    %4 = vector.load %arg1[%c0_5, %c0_6] : memref<16x1xf32, #tpu.memory_space<vmem>>, vector<16x1xf32>
    %c0_7 = arith.constant 0 : index
    %c0_8 = arith.constant 0 : index
    %5 = vector.load %arg8[%c0_7, %c0_8] : memref<1x32xf32, #tpu.memory_space<vmem>>, vector<1x32xf32>
    %6 = vector.broadcast %4 : vector<16x1xf32> to vector<16x32xf32>
    %7 = vector.broadcast %5 : vector<1x32xf32> to vector<16x32xf32>
    %8 = arith.mulf %6, %7 : vector<16x32xf32>
    %9 = arith.addf %3, %8 : vector<16x32xf32>
    %c0_9 = arith.constant 0 : index
    %c0_10 = arith.constant 0 : index
    %10 = vector.load %arg9[%c0_9, %c0_10] : memref<1x32xf32, #tpu.memory_space<vmem>>, vector<1x32xf32>
    %11 = vector.broadcast %10 : vector<1x32xf32> to vector<16x32xf32>
    %12 = arith.addf %9, %11 : vector<16x32xf32>
    %13 = arith.negf %12 : vector<16x32xf32>
    %14 = math.exp %13 : vector<16x32xf32>
    %cst_11 = arith.constant 1.000000e+00 : f32
    %15 = vector.broadcast %cst_11 : f32 to vector<16x32xf32>
    %16 = arith.addf %15, %14 : vector<16x32xf32>
    %17 = arith.divf %15, %16 : vector<16x32xf32>
    %18 = arith.mulf %12, %17 : vector<16x32xf32>
    %19 = vector.broadcast %1 : vector<16x1xf32> to vector<16x32xf32>
    %20 = arith.mulf %18, %19 : vector<16x32xf32>
    %c0_12 = arith.constant 0 : index
    %c0_13 = arith.constant 0 : index
    %21 = vector.load %arg3[%c0_12, %c0_13] : memref<16x16xf32, #tpu.memory_space<vmem>>, vector<16x16xf32>
    %cst_14 = arith.constant dense<0.000000e+00> : vector<16x32xf32>
    %22 = tpu.matmul %21, %20, %cst_14 {dimension_numbers = #tpu.dot_dimension_numbers<[1], [0], [0], [1], [0, 0, 1, 1], [], []>} : vector<16x16xf32>, vector<16x32xf32>, vector<16x32xf32> -> vector<16x32xf32>
    %23 = arith.addf %20, %22 : vector<16x32xf32>
    %c0_15 = arith.constant 0 : index
    %c0_16 = arith.constant 0 : index
    %24 = vector.load %arg10[%c0_15, %c0_16] : memref<32x128xf32, #tpu.memory_space<vmem>>, vector<32x128xf32>
    %cst_17 = arith.constant dense<0.000000e+00> : vector<16x128xf32>
    %25 = tpu.matmul %23, %24, %cst_17 {dimension_numbers = #tpu.dot_dimension_numbers<[1], [0], [0], [1], [0, 0, 1, 1], [], []>} : vector<16x32xf32>, vector<32x128xf32>, vector<16x128xf32> -> vector<16x128xf32>
    %c0_18 = arith.constant 0 : index
    %c0_19 = arith.constant 0 : index
    %26 = vector.load %arg11[%c0_18, %c0_19] : memref<1x128xf32, #tpu.memory_space<vmem>>, vector<1x128xf32>
    %27 = vector.broadcast %26 : vector<1x128xf32> to vector<16x128xf32>
    %28 = arith.addf %25, %27 : vector<16x128xf32>
    %29 = vector.broadcast %1 : vector<16x1xf32> to vector<16x128xf32>
    %30 = arith.mulf %28, %29 : vector<16x128xf32>
    %c0_20 = arith.constant 0 : index
    %c0_21 = arith.constant 0 : index
    %31 = vector.load %arg4[%c0_20, %c0_21] : memref<2x16xf32, #tpu.memory_space<vmem>>, vector<2x16xf32>
    %32 = vector.shape_cast %1 : vector<16x1xf32> to vector<16x1xf32>
    %33 = vector.broadcast %32 : vector<16x1xf32> to vector<16x128xf32>
    %cst_22 = arith.constant dense<0.000000e+00> : vector<2x128xf32>
    %34 = tpu.matmul %31, %33, %cst_22 {dimension_numbers = #tpu.dot_dimension_numbers<[1], [0], [0], [1], [0, 0, 1, 1], [], []>} : vector<2x16xf32>, vector<16x128xf32>, vector<2x128xf32> -> vector<2x128xf32>
    %cst_23 = arith.constant dense<0.000000e+00> : vector<2x128xf32>
    %35 = tpu.matmul %31, %30, %cst_23 {dimension_numbers = #tpu.dot_dimension_numbers<[1], [0], [0], [1], [0, 0, 1, 1], [], []>} : vector<2x16xf32>, vector<16x128xf32>, vector<2x128xf32> -> vector<2x128xf32>
    %cst_24 = arith.constant 1.000000e+00 : f32
    %36 = vector.broadcast %cst_24 : f32 to vector<2x128xf32>
    %37 = arith.maximumf %34, %36 : vector<2x128xf32>
    %38 = arith.divf %35, %37 : vector<2x128xf32>
    %c0_25 = arith.constant 0 : index
    %c0_26 = arith.constant 0 : index
    %39 = vector.load %arg6[%c0_25, %c0_26] : memref<1x128xf32, #tpu.memory_space<vmem>>, vector<1x128xf32>
    %40 = vector.broadcast %39 : vector<1x128xf32> to vector<2x128xf32>
    %41 = arith.mulf %38, %40 : vector<2x128xf32>
    %c0_27 = arith.constant 0 : index
    %c0_28 = arith.constant 0 : index
    %42 = vector.load %arg5[%c0_27, %c0_28] : memref<16x2xf32, #tpu.memory_space<vmem>>, vector<16x2xf32>
    %cst_29 = arith.constant dense<0.000000e+00> : vector<16x128xf32>
    %43 = tpu.matmul %42, %41, %cst_29 {dimension_numbers = #tpu.dot_dimension_numbers<[1], [0], [0], [1], [0, 0, 1, 1], [], []>} : vector<16x2xf32>, vector<2x128xf32>, vector<16x128xf32> -> vector<16x128xf32>
    %44 = vector.broadcast %1 : vector<16x1xf32> to vector<16x128xf32>
    %45 = arith.mulf %43, %44 : vector<16x128xf32>
    %46 = arith.subf %30, %45 : vector<16x128xf32>
    %c0_30 = arith.constant 0 : index
    %c0_31 = arith.constant 0 : index
    %47 = vector.load %arg12[%c0_30, %c0_31] : memref<16x128xf32, #tpu.memory_space<vmem>>, vector<16x128xf32>
    tpu.vector_store %arg12[%c0_30, %c0_31], %46 {strides = array<i32>} : memref<16x128xf32, #tpu.memory_space<vmem>>, vector<16x128xf32>,
    return
  }
}

</mosaic_0001>

<bundles_post_ra>
// kernel: tpu_custom_call.1
= control target key start
LH: loop header
LB: loop body
LE: loop exit
PB: predicated region body
PF: predicated region fallthrough
CT: control target
= control target key end

     0   :  { %vm68_vm0 = vcmask 64512   ;;  %v773_v4 = vmov 0   ;;  %s927_s0 = inlined_call_operand.vmem [shape: f32[16,8], index: 0, kind: input, shape index: {}]   ;;  %s928_s1 = inlined_call_operand.vmem [shape: f32[16,1], index: 1, kind: input, shape index: {}]   ;;  %s929_s2 = inlined_call_operand.vmem [shape: f32[16,1], index: 2, kind: input, shape index: {}]   ;;  %s930_s3 = inlined_call_operand.vmem [shape: f32[16,16], index: 3, kind: input, shape index: {}]   ;;  %s931_s4 = inlined_call_operand.vmem [shape: f32[2,16], index: 4, kind: input, shape index: {}]   ;;  %s932_s5 = inlined_call_operand.vmem [shape: f32[16,2], index: 5, kind: input, shape index: {}]   ;;  %s933_s6 = inlined_call_operand.vmem [shape: f32[1,128], index: 6, kind: input, shape index: {}]   ;;  %s934_s7 = inlined_call_operand.vmem [shape: f32[8,32], index: 7, kind: input, shape index: {}]   ;;  %s935_s8 = inlined_call_operand.vmem [shape: f32[1,32], index: 8, kind: input, shape index: {}]   ;;  %s936_s9 = inlined_call_operand.vmem [shape: f32[1,32], index: 9, kind: input, shape index: {}]   ;;  %s937_s10 = inlined_call_operand.vmem [shape: f32[32,128], index: 10, kind: input, shape index: {}]   ;;  %s938_s11 = inlined_call_operand.vmem [shape: f32[1,128], index: 11, kind: input, shape index: {}]   ;;  %s939_s12 = inlined_call_operand.hbm [shape: f32[16,128], index: 12, kind: output, shape index: {}]  }
   0x1   :  { %v46_v0 = vld [vmem:[%s934_s7] sm:$0xff]  ;;  %v43_v2 = vld [vmem:[%s927_s0 + $0x8] sm:$0xff]  ;;  %737 = vset.pattern.permute.xlu0 %v773_v4 }
   0x2   :  { %v42_v1 = vld [vmem:[%s927_s0] sm:$0xff]  ;;  %670 = vmatprep.subr.mxu0 %v46_v0 }
   0x3   :  { %672 = vmatprep.mubr.msk.f32.mxu0 %vm68_vm0, %v42_v1  ;;  %v47_v3 = vld [vmem:[%s928_s1] sm:$0xff]  ;;  %671 = vmatpush3.msra.mxu0 %v46_v0 }
   0x4   :  { %v44_v5 = vld [vmem:[%s929_s2] sm:$0xff] }
   0x5   :  { %17 = vsyncpa [#allocation3], 0  ;;  %673 = vmatmul.mubr.msk.f32.vlgmr.msra.gmra.mrb[0].mxu0 %vm68_vm0, %v43_v2  ;;  %52 = vperm.xlu0 %737, %v47_v3   ;;  %v48_v6 = vld [vmem:[%s928_s1 + $0x8] sm:$0xff]  ;;  %v185_v8 = vld [vmem:[%s930_s3] sm:$0xff]  ;;  %vm187_vm1 = vcmask 130048   ;;  %v774_v40 = vmov 0.0|0.0  }
   0x6   :  { %738 = vset.pattern.permute.xlu1 %v773_v4  ;;  %v45_v7 = vld [vmem:[%s929_s2 + $0x8] sm:$0xff]  ;;  %679 = vmatprep.mubr.msk.f32.mxu1 %vm187_vm1, %v185_v8  ;;  %v271_v9 = vld [vmem:[%s937_s10] sm:$0xff]  ;;  %v273_v42 = vld [vmem:[%s937_s10 + $0x10] sm:$0xff]  ;;  %vm775_vm2 = vmmov 0   ;;  %v776_v46 = vmov 0.0   ;;  %vm282_vm3 = vcmask 261120  }
   0x7   :  { %175 = vperm.xlu1 %738, %v44_v5   ;;  %v272_v10 = vld [vmem:[%s937_s10 + $0x8] sm:$0xff]  ;;  %v631_v13 = vld [vmem:[%s935_s8] ss:$0 sm:$0xff]  ;;  %v274_v43 = vld [vmem:[%s937_s10 + $0x18] sm:$0xff]  ;;  %vm523_vm4 = vcmask 15360   ;;  %vm530_vm5 = vcmask 1041408  }
   0x8   :  { %v716_v11 = vpack.c.bf16 %v272_v10, %v271_v9  ;;  %v634_v18 = vld [vmem:[%s936_s9] ss:$0 sm:$0xff]  ;;  %v186_v39 = vld [vmem:[%s930_s3 + $0x8] sm:$0xff]  ;;  %v720_v44 = vpack.c.bf16 %v274_v43, %v273_v42  ;;  %s777_s0 = smov [#allocation2]  }
   0x9   :  { %57 = vperm.xlu0 %737, %v48_v6   ;;  %v366_v45 = vld [vmem:[%s931_s4] sm:$0x3]  ;;  %v522_v5 = vld [vmem:[%s932_s5 + $0x8] sm:$0xff]  ;;  %s620_s14 = sshll.u32 %s777_s0, 4  ;;  %s621_s14 = int_to_ptr.vmem [resolvable:$true] %s620_s14 }
   0xa   :  { %717 = vmatprep.subr.bf16.mxu0 %v716_v11  ;;  %v639_v53 = vld [vmem:[%s938_s11] ss:$0 sm:$0xff]  ;;  %p754_p1 = scmp.lt.s32.totalorder %s621_s14, %s621_s14 }
   0xb   :  { %180 = vperm.xlu1 %738, %v45_v7   ;;  %719 = vmatpush3.bf16.msra.mxu0 %v716_v11  ;;  %v521_v61 = vld [vmem:[%s932_s5] sm:$0xff] }
   0xc   :  { %721 = vmatprep.subr.bf16.mxu0 %v720_v44  ;;  %v644_v1 = vld [vmem:[%s933_s6] ss:$0 sm:$0xff]  ;;  %s749_s6 = scalar_lea.vmem %s621_s14, 256 }
   0xd   :  { %p750_p0 = scmp.ne.s32.totalorder %s621_s14, %s749_s6  ;;  %p755_p2 = scmp.lt.s32.totalorder %s749_s6, %s749_s6 }
   0xf   :  { %723 = vmatpush3.bf16.msra.mxu0 %v720_v44  ;;  %p756_p3 = por %p755_p2, %p754_p1 }
  0x11   :  { %p757_p4 = pnand %p756_p3, %p750_p0 }
  0x84   :  { %v53_v12 = vpop.permute.xlu0 %52 }
  0x85   :  { %v66_v16 = vmul.f32 %v631_v13, %v53_v12 }
  0x86   :  { %v882_v30 = vpop.permute.xlu1 %175 }
  0x88   :  { %v58_v14 = vpop.permute.xlu0 %57 }
  0x89   :  { %v67_v15 = vmul.f32 %v631_v13, %v58_v14 }
  0x8a   :  { %v181_v35 = vpop.permute.xlu1 %180 }
  0x8b   :  { %v725_v41 = vpack.c.bf16 %v181_v35, %v882_v30 }
  0xd8   :  { %v674_v17 = vpop.f32.mrb[0].mxu0 }
  0xd9   :  { %v147_v19 = vadd.f32 %v674_v17, %v67_v15  ;;  %v141_v20 = vpop.f32.mrb[1].mxu0 }
  0xda   :  { %v142_v21 = vadd.f32 %v141_v20, %v66_v16 }
  0xdb   :  { %v158_v22 = vadd.f32 %v634_v18, %v147_v19 }
  0xdc   :  { %v157_v23 = vadd.f32 %v634_v18, %v142_v21 }
  0xdd   :  { %v636_v24 = vmul.f32 -1.442695, %v158_v22 }
  0xde   :  { %v635_v25 = vmul.f32 -1.442695, %v157_v23 }
  0xdf   :  { %739 = vpow2.f32 %v636_v24 }
  0xe0   :  { %741 = vpow2.f32 %v635_v25 }
  0xe9   :  { %v740_v26 = vpop.eup %739 }
  0xea   :  { %v742_v27 = vpop.eup %741  ;;  %v166_v28 = vadd.f32 1.0, %v740_v26 }
  0xeb   :  { %v165_v29 = vadd.f32 1.0, %v742_v27 }
  0xec   :  { %743 = vrcp.f32 %v166_v28 }
  0xed   :  { %745 = vrcp.f32 %v165_v29 }
  0xf6   :  { %v744_v31 = vpop.eup %743 }
  0xf7   :  { %v746_v32 = vpop.eup %745  ;;  %v172_v33 = vmul.f32 %v744_v31, %v158_v22 }
  0xf8   :  { %v171_v34 = vmul.f32 %v746_v32, %v157_v23 }
  0xf9   :  { %v184_v36 = vmul.f32 %v181_v35, %v172_v33 }
  0xfa   :  { %v183_v37 = vmul.f32 %v882_v30, %v171_v34 }
  0xfc   :  { %v712_v38 = vpack.c.bf16 %v184_v36, %v183_v37 }
  0xfe   :  { %713 = vmatprep.subr.bf16.mxu1 %v712_v38 }
  0xff   :  { %715 = vmatpush3.bf16.msra.mxu1 %v712_v38 }
 0x100   :  { %724 = vmatprep.subr.bf16.mxu1 %v774_v40 }
 0x102   :  { %680 = vmatmul.mubr.msk.f32.vlgmr.msra.gmra.mrb[0].mxu1 %vm187_vm1, %v186_v39 }
 0x103   :  { %726 = vmatpush3.bf16.msra.mxu1 %v725_v41  ;;  %697 = vmatprep.mubr.msk.f32.mxu1 %vm775_vm2, %v776_v46 }
 0x104   :  { %727 = vmatprep.subr.bf16.mxu1 %v774_v40 }
 0x106   :  { %698 = vmatmul.mubr.msk.f32.vlgmr.msra.gmra.mrb[2].mxu1 %vm187_vm1, %v366_v45 }
 0x107   :  { %704 = vmatprep.mubr.msk.f32.mxu1 %vm775_vm2, %v776_v46 }
 0x1d5   :  { %v681_v47 = vpop.f32.mrb[0].mxu1 }
 0x1d6   :  { %v260_v48 = vpop.f32.mrb[1].mxu1  ;;  %v270_v50 = vadd.f32 %v681_v47, %v184_v36 }
 0x1d7   :  { %v269_v49 = vadd.f32 %v260_v48, %v183_v37 }
 0x1d9   :  { %690 = vmatprep.mubr.msk.f32.mxu0 %vm282_vm3, %v269_v49  ;;  %v436_v51 = vpop.f32.mrb[2].mxu1 }
 0x1da   :  { %691 = vmatmul.mubr.msk.f32.vlgmr.msra.gmra.mrb[2].mxu0 %vm282_vm3, %v270_v50  ;;  %v699_v52 = vpop.f32.mrb[3].mxu1  ;;  %v510_v62 = vmax.f32 %v436_v51, 1.0 }
 0x1db   :  { %709 = vmatprep.mubr.msk.f32.mxu0 %vm523_vm4, %v521_v61 }
 0x1dc   :  { %747 = vrcp.f32 %v510_v62 }
 0x1e6   :  { %v748_v63 = vpop.eup %747 }
 0x2ad   :  { %v692_v54 = vpop.f32.mrb[2].mxu0 }
 0x2ae   :  { %v361_v55 = vadd.f32 %v692_v54, %v639_v53  ;;  %v355_v56 = vpop.f32.mrb[3].mxu0 }
 0x2af   :  { %v356_v57 = vadd.f32 %v639_v53, %v355_v56 }
 0x2b0   :  { %v365_v58 = vmul.f32 %v361_v55, %v181_v35 }
 0x2b1   :  { %v364_v59 = vmul.f32 %v356_v57, %v882_v30 }
 0x2b3   :  { %v728_v60 = vpack.c.bf16 %v365_v58, %v364_v59 }
 0x2b5   :  { %729 = vmatpush3.bf16.msra.mxu1 %v728_v60 }
 0x2b8   :  { %705 = vmatmul.mubr.msk.f32.vlgmr.msra.gmra.mrb[4].mxu1 %vm187_vm1, %v366_v45 }
 0x38b   :  { %v506_v0 = vpop.f32.mrb[4].mxu1 }
 0x38c   :  { %v512_v2 = vmul.f32 %v748_v63, %v506_v0  ;;  %v706_v3 = vpop.f32.mrb[5].mxu1 }
 0x38e   :  { %v520_v4 = vmul.f32 %v644_v1, %v512_v2 }
 0x390   :  { %707 = vmatprep.subr.msk.mxu0 %vm530_vm5, %v520_v4 }
 0x391   :  { %708 = vmatpush3.msk.msra.mxu0 %vm530_vm5, %v520_v4 }
 0x392   :  { %710 = vmatmul.mubr.msk.f32.vlgmr.msra.gmra.mrb[4].mxu0 %vm523_vm4, %v522_v5 }
 0x465   :  { %v711_v6 = vpop.f32.mrb[4].mxu0 }
 0x466   :  { %v610_v7 = vmul.f32 %v711_v6, %v181_v35  ;;  %v600_v8 = vpop.f32.mrb[5].mxu0 }
 0x467   :  { %v609_v9 = vmul.f32 %v600_v8, %v882_v30 }
 0x468   :  { %v612_v10 = vsub.f32 %v365_v58, %v610_v7 }
 0x469   :  { %v611_v11 = vsub.f32 %v364_v59, %v609_v9 }
 0x46a   :  { %614 = vst [vmem:[#allocation2 + $0x8] sm:$0xff] %v612_v10 }
 0x46b   :  { %613 = vst [vmem:[#allocation2] sm:$0xff] %v611_v11 }
 0x46c   :  { %760 = shalt.err (!%p757_p4)
}
 0x46d   :  { %s761_s16 = scalar_lea.hbm %s939_s12, 256 }
 0x46e   :  { %p762_p5 = scmp.ne.s32.totalorder %s939_s12, %s761_s16  ;;  %p765_p6 = scmp.lt.u32.totalorder %s761_s16, %s939_s12 }
 0x470   :  { %p767_p7 = pnand %p765_p6, %p762_p5 }
 0x472   :  { %770 = shalt.err (!%p767_p7)
}
 0x473   :  { %s778_s2 = smov 128   ;;  %s779_s20 = smov 8  }
 0x474   :  { %626 = dma.vmem_to_hbm [thread:$0]  %s621_s14, 256, %s939_s12, [#allocation3], %s778_s2, %s778_s2, %s779_s20  }
 0x475   :  { %771 = dma.done.wait [#allocation3], 256  }
 0x476   :  { %772 = vsyncadd [#allocation3], 4294967040 }
 0x477   :  { %630 = vsyncpa [#allocation3], 1 }

</bundles_post_ra>
